<compile_context>
chip_gen: v7x
topology: tpu7x:2x2x1
jax: 0.10.0
libtpu: 0.0.40
codegen_flags: <defaults>
</compile_context>

<pallas_src>
import functools

import jax
import jax.numpy as jnp
from jax import lax
from jax.experimental import pallas as pl
from jax.experimental.pallas import tpu as pltpu


# --------------------------------------------------------------------------
# Kernels
# --------------------------------------------------------------------------
def _grn_fused_kernel(x_ref, g_ref, b_ref, o_ref, *, eps, n_rep, row_chunk):
    """One batch element, whole (R, L) slab resident in VMEM.

    x_ref/o_ref: (R, L) with L = n_rep * C; g_ref/b_ref: (1, L) f32.
    Streams row chunks (re-reading x_ref) so the f32 upcast never lives as a
    full slab.
    """
    R, L = x_ref.shape
    C = L // n_rep
    n_full = R // row_chunk
    rem = R - n_full * row_chunk

    def chunk_sumsq(start, size):
        xc = x_ref[pl.ds(start, size), :].astype(jnp.float32)
        return jnp.sum(xc * xc, axis=0, keepdims=True)          # (1, L)

    # Pass A: sum(x^2) over rows (sublane reduce per chunk).
    acc = jnp.zeros((1, L), jnp.float32)
    if n_full > 0:
        def red_body(i, a):
            start = pl.multiple_of(i * row_chunk, row_chunk)
            return a + chunk_sumsq(start, row_chunk)
        acc = lax.fori_loop(0, n_full, red_body, acc)
    if rem > 0:
        acc = acc + chunk_sumsq(n_full * row_chunk, rem)

    # Combine the n_rep channel replicas along lanes: after summing all
    # cyclic shifts by multiples of C, every C-lane group holds the total.
    total = acc
    for j in range(1, n_rep):
        total = total + pltpu.roll(acc, shift=j * C, axis=1)

    gx = jnp.sqrt(total)                                         # (1, L)
    mean = jnp.mean(gx, axis=-1, keepdims=True)                  # (1, 1)
    nx = gx / (mean + eps)                                       # (1, L)

    scale1 = g_ref[...] * nx + 1.0                               # gamma*Nx + 1
    beta = b_ref[...]

    # Pass B: y = x * (gamma*Nx + 1) + beta, chunk-wise (re-read x_ref).
    def apply(start, size):
        xc = x_ref[pl.ds(start, size), :].astype(jnp.float32)
        o_ref[pl.ds(start, size), :] = (xc * scale1 + beta).astype(o_ref.dtype)

    if n_full > 0:
        def app_body(i, carry):
            start = pl.multiple_of(i * row_chunk, row_chunk)
            apply(start, row_chunk)
            return carry
        lax.fori_loop(0, n_full, app_body, 0)
    if rem > 0:
        apply(n_full * row_chunk, rem)


def _grn_reduce_kernel(x_ref, nx_ref, acc_ref, *, eps, n_rep, rows_total, ragged):
    """Tiled pass 1: accumulate sum(x^2) over spatial tiles, emit Nx at end."""
    t = pl.program_id(1)
    ts, L = x_ref.shape
    C = L // n_rep

    @pl.when(t == 0)
    def _():
        acc_ref[...] = jnp.zeros_like(acc_ref)

    x = x_ref[...].astype(jnp.float32)                           # (ts, L)
    if ragged:
        # Mask garbage rows of the (out-of-bounds) tail tile before squaring.
        row = t * ts + lax.broadcasted_iota(jnp.int32, (ts, 1), 0)
        x = jnp.where(row < rows_total, x, 0.0)
    acc_ref[...] += jnp.sum(x * x, axis=0, keepdims=True)

    @pl.when(t == pl.num_programs(1) - 1)
    def _():
        acc = acc_ref[...]
        total = acc
        for j in range(1, n_rep):
            total = total + pltpu.roll(acc, shift=j * C, axis=1)
        gx = jnp.sqrt(total)
        mean = jnp.mean(gx, axis=-1, keepdims=True)
        nx_ref[...] = gx / (mean + eps)


def _grn_apply_kernel(x_ref, nx_ref, g_ref, b_ref, o_ref):
    """Tiled pass 2: y = gamma*(x*Nx) + beta + x on one spatial tile."""
    x = x_ref[...].astype(jnp.float32)                           # (ts, L)
    scale1 = g_ref[...] * nx_ref[...] + 1.0                      # (1, L)
    o_ref[...] = (x * scale1 + b_ref[...]).astype(o_ref.dtype)


# --------------------------------------------------------------------------
# Wrapper
# --------------------------------------------------------------------------
def grn_forward(x, gamma, beta, *, eps=1e-6, spatial_tile=None):
    """GRN over channels_last x:(B,H,W,C); gamma/beta broadcastable to C."""
    B, H, W, C = x.shape
    HW = H * W

    # Lane-dense packing: fold k spatial positions onto the lane axis so the
    # last dim is a full 128 lanes (unmasked vector stores) when C < 128.
    k = 1
    if C < 128 and 128 % C == 0:
        kk = 128 // C
        if HW % kk == 0:
            k = kk
    R = HW // k
    L = k * C

    x3 = x.reshape(B, R, L)                                  # free (row-major)
    g_flat = jnp.tile(gamma.reshape(-1).astype(jnp.float32), k).reshape(1, 1, L)
    b_flat = jnp.tile(beta.reshape(-1).astype(jnp.float32), k).reshape(1, 1, L)

    itemsize = x.dtype.itemsize
    slab_bytes = R * L * itemsize

    # Per-generation VMEM budget (v5e/v6e: 128 MiB, v7x: 64 MiB per TC).
    try:
        vmem_cap = int(pltpu.get_tpu_info().vmem_capacity_bytes)
    except Exception:
        vmem_cap = 64 * 1024 * 1024
    vmem_limit = min((vmem_cap * 3) // 4, 96 * 1024 * 1024)

    # Fused footprint: double-buffered native-dtype input + output slabs plus
    # small f32 chunk temporaries (the f32 slab is never fully materialized).
    fused_footprint = 4 * slab_bytes + (4 << 20)
    use_fused = (spatial_tile is None) and (fused_footprint <= vmem_limit)

    if use_fused:
        # ~256 KiB f32 per row chunk, sublane-aligned.
        row_chunk = max(8, (min(R, (256 * 1024) // (L * 4)) // 8) * 8)
        out = pl.pallas_call(
            functools.partial(_grn_fused_kernel, eps=float(eps), n_rep=k,
                              row_chunk=row_chunk),
            out_shape=jax.ShapeDtypeStruct((B, R, L), x.dtype),
            grid=(B,),
            in_specs=[
                pl.BlockSpec((None, R, L), lambda i: (i, 0, 0)),
                pl.BlockSpec((None, 1, L), lambda i: (0, 0, 0)),
                pl.BlockSpec((None, 1, L), lambda i: (0, 0, 0)),
            ],
            out_specs=pl.BlockSpec((None, R, L), lambda i: (i, 0, 0)),
            compiler_params=pltpu.CompilerParams(
                dimension_semantics=("parallel",),
                vmem_limit_bytes=int(vmem_limit)),
        )(x3, g_flat, b_flat)
        return out.reshape(B, H, W, C)

    # ------------------------------------------------------------------
    # Tiled two-pass fallback (no padding, no output slice; ragged tail is
    # masked in pass 1; Pallas masks the partial output writeback in pass 2).
    # ------------------------------------------------------------------
    if spatial_tile is not None:
        ts = int(spatial_tile)
    else:
        ts = (2 << 20) // (L * itemsize)          # ~2 MiB x block
    ts = max(8, (ts // 8) * 8)
    if ts >= R:
        ts = R
    n_t = pl.cdiv(R, ts)
    ragged = (R % ts) != 0

    # Pass 1: per-(batch, channel) Nx factor.  Reduction axis last.
    nx = pl.pallas_call(
        functools.partial(_grn_reduce_kernel, eps=float(eps), n_rep=k,
                          rows_total=R, ragged=ragged),
        out_shape=jax.ShapeDtypeStruct((B, 1, L), jnp.float32),
        grid=(B, n_t),
        in_specs=[pl.BlockSpec((None, ts, L), lambda i, t: (i, t, 0))],
        out_specs=pl.BlockSpec((None, 1, L), lambda i, t: (i, 0, 0)),
        scratch_shapes=[pltpu.VMEM((1, L), jnp.float32)],
        compiler_params=pltpu.CompilerParams(
            dimension_semantics=("parallel", "arbitrary"),
            vmem_limit_bytes=int(vmem_limit)),
    )(x3)

    # Pass 2: elementwise apply, fully parallel (spatial axis parallel so
    # megacore / v7x can split it even when B is small).
    out = pl.pallas_call(
        _grn_apply_kernel,
        out_shape=jax.ShapeDtypeStruct((B, R, L), x.dtype),
        grid=(B, n_t),
        in_specs=[
            pl.BlockSpec((None, ts, L), lambda i, t: (i, t, 0)),
            pl.BlockSpec((None, 1, L), lambda i, t: (i, 0, 0)),
            pl.BlockSpec((None, 1, L), lambda i, t: (0, 0, 0)),
            pl.BlockSpec((None, 1, L), lambda i, t: (0, 0, 0)),
        ],
        out_specs=pl.BlockSpec((None, ts, L), lambda i, t: (i, t, 0)),
        compiler_params=pltpu.CompilerParams(
            dimension_semantics=("parallel", "parallel"),
            vmem_limit_bytes=int(vmem_limit)),
    )(x3, nx, g_flat, b_flat)

    return out.reshape(B, H, W, C)


# --------------------------------------------------------------------------
# Pure-JAX reference (mirrors the PyTorch module exactly)
# --------------------------------------------------------------------------
def grn_reference(x, gamma, beta, eps=1e-6):
    gx = jnp.sqrt(jnp.sum(x * x, axis=(1, 2), keepdims=True))   # (B,1,1,C)
    nx = gx / (jnp.mean(gx, axis=-1, keepdims=True) + eps)
    return gamma * (x * nx) + beta + x


# --------------------------------------------------------------------------
if __name__ == "__main__":
    key = jax.random.PRNGKey(0)
    kx, kg, kb = jax.random.split(key, 3)

    B, H, W, C = 2, 16, 16, 32
    x = jax.random.normal(kx, (B, H, W, C), dtype=jnp.float32)
    # PyTorch initializes gamma/beta to zeros (output == x); use random values
    # so the normalization path is actually exercised.
    gamma = 0.1 * jax.random.normal(kg, (1, 1, 1, C), dtype=jnp.float32)
    beta = 0.1 * jax.random.normal(kb, (1, 1, 1, C), dtype=jnp.float32)

    ref = grn_reference(x, gamma, beta)

    # Fused single-read fast path (lane-packed to 128 lanes, k = 128 // 32).
    out_fused = jax.block_until_ready(jax.jit(grn_forward)(x, gamma, beta))
    # Tiled two-pass fallback, even tiling (R=64 packed rows / 16-row tiles).
    out_even = jax.block_until_ready(
        jax.jit(functools.partial(grn_forward, spatial_tile=16))(x, gamma, beta))
    # Tiled fallback with a ragged tail tile (64 rows / 24-row tiles).
    out_ragged = jax.block_until_ready(
        jax.jit(functools.partial(grn_forward, spatial_tile=24))(x, gamma, beta))

    for name, out in (("fused", out_fused), ("tiled_even", out_even),
                      ("tiled_ragged", out_ragged)):
        assert out.shape == (B, H, W, C), (name, out.shape)
        err = float(jnp.max(jnp.abs(out - ref)))
        assert err < 1e-5, f"{name} path mismatch, max err {err}"
    print("KERNEL_OK")
</pallas_src>

<mosaic_0001>
module attributes {stable_mosaic.version = 11 : i64} {
  func.func @_grn_fused_kernel(%arg0: i32, %arg1: memref<1x64x128xf32, #tpu.memory_space<vmem>>, %arg2: memref<1x1x128xf32, #tpu.memory_space<vmem>>, %arg3: memref<1x1x128xf32, #tpu.memory_space<vmem>>, %arg4: memref<1x64x128xf32, #tpu.memory_space<vmem>>) attributes {dimension_semantics = [#tpu.dimension_semantics<parallel>], iteration_bounds = array<i64: 2>, scalar_prefetch = 0 : i64, scratch_operands = 0 : i64, tpu.core_type = #tpu.core_type<tc>, window_params = [{transform_indices = @transform_0, window_bounds = array<i64: 1, 64, 128>}, {pipeline_mode = #tpu.pipeline_mode<synchronous>, transform_indices = @transform_1, window_bounds = array<i64: 1, 1, 128>}, {pipeline_mode = #tpu.pipeline_mode<synchronous>, transform_indices = @transform_2, window_bounds = array<i64: 1, 1, 128>}, {transform_indices = @transform_3, window_bounds = array<i64: 1, 64, 128>}]} {
    %cst = arith.constant 0.000000e+00 : f32
    %0 = vector.broadcast %cst : f32 to vector<1x128xf32>
    %c0_i32 = arith.constant 0 : i32
    %c64_i32 = arith.constant 64 : i32
    %1 = arith.muli %c0_i32, %c64_i32 : i32
    %2 = tpu.assume_multiple %1, 64 : i32
    %c0 = arith.constant 0 : index
    %3 = arith.index_cast %2 : i32 to index
    %c0_0 = arith.constant 0 : index
    %4 = vector.load %arg1[%c0, %3, %c0_0] : memref<1x64x128xf32, #tpu.memory_space<vmem>>, vector<1x64x128xf32>
    %5 = vector.shape_cast %4 : vector<1x64x128xf32> to vector<64x128xf32>
    %6 = arith.mulf %5, %5 : vector<64x128xf32>
    %cst_1 = arith.constant dense<0.000000e+00> : vector<128xf32>
    %7 = vector.multi_reduction <add>, %6, %cst_1 [0] : vector<64x128xf32> to vector<128xf32>
    %8 = vector.shape_cast %7 : vector<128xf32> to vector<1x128xf32>
    %9 = arith.addf %0, %8 : vector<1x128xf32>
    %c1_i32 = arith.constant 1 : i32
    %c32_i32 = arith.constant 32 : i32
    %10 = tpu.dynamic_rotate %9 by %c32_i32 dim 1 : vector<1x128xf32>, i32 -> vector<1x128xf32>
    %11 = arith.addf %9, %10 : vector<1x128xf32>
    %c64_i32_2 = arith.constant 64 : i32
    %12 = tpu.dynamic_rotate %9 by %c64_i32_2 dim 1 : vector<1x128xf32>, i32 -> vector<1x128xf32>
    %13 = arith.addf %11, %12 : vector<1x128xf32>
    %c96_i32 = arith.constant 96 : i32
    %14 = tpu.dynamic_rotate %9 by %c96_i32 dim 1 : vector<1x128xf32>, i32 -> vector<1x128xf32>
    %15 = arith.addf %13, %14 : vector<1x128xf32>
    %16 = math.sqrt %15 : vector<1x128xf32>
    %cst_3 = arith.constant dense<0.000000e+00> : vector<1xf32>
    %17 = vector.multi_reduction <add>, %16, %cst_3 [1] : vector<1x128xf32> to vector<1xf32>
    %18 = vector.shape_cast %17 : vector<1xf32> to vector<1x1xf32>
    %cst_4 = arith.constant 1.280000e+02 : f32
    %19 = vector.broadcast %cst_4 : f32 to vector<1x1xf32>
    %20 = arith.divf %18, %19 : vector<1x1xf32>
    %cst_5 = arith.constant 9.99999997E-7 : f32
    %21 = vector.broadcast %cst_5 : f32 to vector<1x1xf32>
    %22 = arith.addf %20, %21 : vector<1x1xf32>
    %23 = vector.broadcast %22 : vector<1x1xf32> to vector<1x128xf32>
    %24 = arith.divf %16, %23 : vector<1x128xf32>
    %c0_6 = arith.constant 0 : index
    %c0_7 = arith.constant 0 : index
    %c0_8 = arith.constant 0 : index
    %25 = vector.load %arg2[%c0_6, %c0_7, %c0_8] : memref<1x1x128xf32, #tpu.memory_space<vmem>>, vector<1x1x128xf32>
    %26 = vector.shape_cast %25 : vector<1x1x128xf32> to vector<1x128xf32>
    %27 = arith.mulf %26, %24 : vector<1x128xf32>
    %cst_9 = arith.constant 1.000000e+00 : f32
    %28 = vector.broadcast %cst_9 : f32 to vector<1x128xf32>
    %29 = arith.addf %27, %28 : vector<1x128xf32>
    %c0_10 = arith.constant 0 : index
    %c0_11 = arith.constant 0 : index
    %c0_12 = arith.constant 0 : index
    %30 = vector.load %arg3[%c0_10, %c0_11, %c0_12] : memref<1x1x128xf32, #tpu.memory_space<vmem>>, vector<1x1x128xf32>
    %31 = vector.shape_cast %30 : vector<1x1x128xf32> to vector<1x128xf32>
    %c0_i32_13 = arith.constant 0 : i32
    %c64_i32_14 = arith.constant 64 : i32
    %32 = arith.muli %c0_i32_13, %c64_i32_14 : i32
    %33 = tpu.assume_multiple %32, 64 : i32
    %c0_15 = arith.constant 0 : index
    %34 = arith.index_cast %33 : i32 to index
    %c0_16 = arith.constant 0 : index
    %35 = vector.load %arg1[%c0_15, %34, %c0_16] : memref<1x64x128xf32, #tpu.memory_space<vmem>>, vector<1x64x128xf32>
    %36 = vector.shape_cast %35 : vector<1x64x128xf32> to vector<64x128xf32>
    %37 = vector.broadcast %29 : vector<1x128xf32> to vector<64x128xf32>
    %38 = arith.mulf %36, %37 : vector<64x128xf32>
    %39 = vector.broadcast %31 : vector<1x128xf32> to vector<64x128xf32>
    %40 = arith.addf %38, %39 : vector<64x128xf32>
    %c0_17 = arith.constant 0 : index
    %41 = arith.index_cast %33 : i32 to index
    %c0_18 = arith.constant 0 : index
    %42 = vector.load %arg4[%c0_17, %41, %c0_18] : memref<1x64x128xf32, #tpu.memory_space<vmem>>, vector<1x64x128xf32>
    %43 = vector.shape_cast %42 : vector<1x64x128xf32> to vector<64x128xf32>
    %44 = vector.shape_cast %40 : vector<64x128xf32> to vector<1x64x128xf32>
    tpu.vector_store %arg4[%c0_17, %41, %c0_18], %44 {strides = array<i32>} : memref<1x64x128xf32, #tpu.memory_space<vmem>>, vector<1x64x128xf32>,
    %c1_i32_19 = arith.constant 1 : i32
    return
  }
  func.func @transform_0(%arg0: i32) -> (i32, i32, i32) {
    %c0_i32 = arith.constant 0 : i32
    %c0_i32_0 = arith.constant 0 : i32
    %c0_i32_1 = arith.constant 0 : i32
    return %arg0, %c0_i32, %c0_i32_0 : i32, i32, i32
  }
  func.func @transform_1(%arg0: i32) -> (i32, i32, i32) {
    %c0_i32 = arith.constant 0 : i32
    %c0_i32_0 = arith.constant 0 : i32
    %c0_i32_1 = arith.constant 0 : i32
    %c0_i32_2 = arith.constant 0 : i32
    return %c0_i32, %c0_i32_0, %c0_i32_1 : i32, i32, i32
  }
  func.func @transform_2(%arg0: i32) -> (i32, i32, i32) {
    %c0_i32 = arith.constant 0 : i32
    %c0_i32_0 = arith.constant 0 : i32
    %c0_i32_1 = arith.constant 0 : i32
    %c0_i32_2 = arith.constant 0 : i32
    return %c0_i32, %c0_i32_0, %c0_i32_1 : i32, i32, i32
  }
  func.func @transform_3(%arg0: i32) -> (i32, i32, i32) {
    %c0_i32 = arith.constant 0 : i32
    %c0_i32_0 = arith.constant 0 : i32
    %c0_i32_1 = arith.constant 0 : i32
    return %arg0, %c0_i32, %c0_i32_0 : i32, i32, i32
  }
}

</mosaic_0001>

<bundles_post_ra>
// kernel: tile.10
= control target key start
LH: loop header
LB: loop body
LE: loop exit
PB: predicated region body
PF: predicated region fallthrough
CT: control target
= control target key end

     0   :  { %s22_s0 = inlined_call_operand.vmem [shape: f32[32], index: 0, kind: input, shape index: {}]   ;;  %s23_s1 = inlined_call_operand.vmem [shape: f32[4,32], index: 1, kind: output, shape index: {}]  }
   0x1   :  { %v4_v0 = vld [vmem:[%s22_s0] ss:$0 sm:$0xff] }
   0x2   :  { %5 = vst [vmem:[%s23_s1] sm:$0xf] %v4_v0 }

// kernel: tile.11
= control target key start
LH: loop header
LB: loop body
LE: loop exit
PB: predicated region body
PF: predicated region fallthrough
CT: control target
= control target key end

     0   :  { %vm7_vm0 = vcmask 261120   ;;  %s37_s8 = smov 32   ;;  %s38_s9 = smov 64   ;;  %vm13_vm1 = vcmask 1048320   ;;  %vm19_vm2 = vcmask 785920   ;;  %vm25_vm3 = vcmask 523520   ;;  %s55_s0 = inlined_call_operand.vmem [shape: f32[4,32], index: 0, kind: input, shape index: {}]   ;;  %s56_s1 = inlined_call_operand.vmem [shape: f32[1,1,128], index: 1, kind: output, shape index: {}]  }
   0x1   :  { %v4_v0 = vld [vmem:[%s55_s0] sm:$0xf]  ;;  %s36_s0 = smov 96  }
   0x2   :  { %5 = vst [vmem:[#allocation1] sm:$0xf] %v4_v0 }
   0x9   :  { %v10_v1 = vld [vmem:[#allocation1 + $0x3] sm:$0x1]   ;;  %v22_v2 = vld [vmem:[#allocation1 + $0x1] sm:$0x1]   ;;  %v6_v3 = vld [vmem:[#allocation1] sm:$0x1]  }
   0xa   :  { %11 = vrot.lane.b32.xlu0 %v10_v1, %s36_s0  ;;  %23 = vrot.lane.b32.xlu1 %v22_v2, %s37_s8  ;;  %v16_v4 = vld [vmem:[#allocation1 + $0x2] sm:$0x1]   ;;  %8 = vst.msk [vmem:[#allocation0] sm:$0x1] %vm7_vm0, %v6_v3  }
   0xe   :  { %17 = vrot.lane.b32.xlu0 %v16_v4, %s38_s9 }
  0x7c   :  { %v12_v5 = vpop.permute.xlu0 %11   ;;  %v24_v6 = vpop.permute.xlu1 %23  }
  0x7d   :  { %14 = vst.msk [vmem:[#allocation0] sm:$0x1] %vm13_vm1, %v12_v5  }
  0x80   :  { %v18_v7 = vpop.permute.xlu0 %17  }
  0x81   :  { %20 = vst.msk [vmem:[#allocation0] sm:$0x1] %vm19_vm2, %v18_v7  }
  0x82   :  { %26 = vst.msk [vmem:[#allocation0] sm:$0x1] %vm25_vm3, %v24_v6  }
  0x89   :  { %v30_v8 = vld [vmem:[#allocation0] sm:$0x1] }
  0x8a   :  { %32 = vst [vmem:[%s56_s1] sm:$0x1] %v30_v8 }

// kernel: grn_forward.1
= control target key start
LH: loop header
LB: loop body
LE: loop exit
PB: predicated region body
PF: predicated region fallthrough
CT: control target
= control target key end

     0   :  { %s381_s12 = smov 0   ;;  %s436_s0 = inlined_call_operand.vmem [shape: f32[2,64,128], index: 0, kind: input, shape index: {}]   ;;  %s437_s1 = inlined_call_operand.vmem [shape: f32[1,1,128], index: 1, kind: input, shape index: {}]   ;;  %s438_s2 = inlined_call_operand.vmem [shape: f32[1,1,128], index: 2, kind: input, shape index: {}]   ;;  %s439_s3 = inlined_call_operand.vmem [shape: f32[2,64,128], index: 3, kind: output, shape index: {}]  }
   0x1 LB: > { %s321_s13 = sadd.s32 4294967295, %s356_s12   ;;  %p325_p0 = scmp.ge.s32.totalorder %s356_s12, 1  ;;  %s356_s12 = sphi %s381_s12, %s13_s12  }
   0x2   : > { %p137_p1 = scmp.lt.s32.totalorder %s356_s12, 3 }
   0x4   : > { %p138_p2 = pnand %p325_p0, %p137_p1 }
   0x5   : > { %p161_p3 = scmp.lt.s32.totalorder (!%p138_p2), %s321_s13, 1  ;;  %s358_s18 = smov (!%p138_p2), 32   ;;  %vm217_vm1 = vcmask (!%p138_p2), 1040384   ;;  %v231_v44 = vlaneseq (!%p138_p2)  ;;  %v226_v47 = vld [vmem:[%s437_s1] sm:$0x1] (!%p138_p2) }
   0x6   : > { %141 = sbr.rel (%p138_p2) target bundleno = 357 (0x165), region = 32  ;;  %s359_s19 = smov (!%p138_p2), 96   ;;  %v330_v53 = vld [vmem:[%s438_s2] ss:$0 sm:$0xff] (!%p138_p2) }
   0x7   : > { %s360_s20 = smov (!%p138_p2), 64   ;;  %v232_v45 = vshrl.u32 (!%p138_p2), %v231_v44, 7 }
   0x9   : > { %v233_v49 = vsub.s32 (!%p138_p2), 0, %v232_v45 }
   0xd   : > { %s441_s13 = smov (!%p161_p3, %s321_s13), 1 }
   0xe   : > { %s333_s14 = sshll.u32 %s441_s13, 6 }
   0xf   : > { %s165_s17 = scalar_lea.vmem %s436_s0, %s333_s14  ;;  %s170_s27 = scalar_lea.vmem %s439_s3, %s333_s14 }
  0x10   : > { %v397_v0 = vld [vmem:[%s165_s17] sm:$0xff]  ;;  %v399_v1 = vld [vmem:[%s165_s17 + $0x8] sm:$0xff]  ;;  %v401_v2 = vld [vmem:[%s165_s17 + $0x10] sm:$0xff] }
  0x11   : > { %v403_v3 = vld [vmem:[%s165_s17 + $0x18] sm:$0xff]  ;;  %v179_v4 = vmul.f32 %v397_v0, %v397_v0  ;;  %v180_v5 = vmul.f32 %v399_v1, %v399_v1  ;;  %v181_v6 = vmul.f32 %v401_v2, %v401_v2  ;;  %v411_v7 = vld [vmem:[%s165_s17 + $0x20] sm:$0xff]  ;;  %v176_v10 = vld [vmem:[%s165_s17 + $0x28] sm:$0xff] }
  0x12   : > { %v182_v8 = vmul.f32 %v403_v3, %v403_v3  ;;  %v183_v11 = vmul.f32 %v411_v7, %v411_v7  ;;  %v177_v13 = vld [vmem:[%s165_s17 + $0x30] sm:$0xff]  ;;  %v184_v14 = vmul.f32 %v176_v10, %v176_v10  ;;  %v178_v16 = vld [vmem:[%s165_s17 + $0x38] sm:$0xff] }
  0x13   : > { %v187_v9 = vadd.f32 %v180_v5, %v179_v4  ;;  %v185_v17 = vmul.f32 %v177_v13, %v177_v13  ;;  %v186_v19 = vmul.f32 %v178_v16, %v178_v16 }
  0x15   : > { %v188_v12 = vadd.f32 %v187_v9, %v181_v6 }
  0x17   : > { %v189_v15 = vadd.f32 %v188_v12, %v182_v8 }
  0x19   : > { %v190_v18 = vadd.f32 %v189_v15, %v183_v11 }
  0x1b   : > { %v191_v20 = vadd.f32 %v190_v18, %v184_v14 }
  0x1d   : > { %v192_v21 = vadd.f32 %v191_v20, %v185_v17 }
  0x1f   : > { %v193_v22 = vadd.f32 %v192_v21, %v186_v19 }
  0x21   : > { %v194_v23 = vrot.slane %v193_v22, 4 }
  0x23   : > { %v195_v24 = vadd.f32 %v194_v23, %v193_v22 }
  0x25   : > { %v196_v25 = vrot.slane %v195_v24, 2 }
  0x27   : > { %v197_v26 = vadd.f32 %v196_v25, %v195_v24 }
  0x29   : > { %v198_v27 = vrot.slane %v197_v26, 1 }
  0x2b   : > { %v199_v28 = vadd.f32 %v198_v27, %v197_v26 }
  0x2d   : > { %201 = vrot.lane.b32.xlu0 %v199_v28, %s358_s18  ;;  %207 = vrot.lane.b32.xlu1 %v199_v28, %s359_s19 }
  0x31   : > { %204 = vrot.lane.b32.xlu0 %v199_v28, %s360_s20 }
  0x9f   : > { %v202_v29 = vpop.permute.xlu0 %201  ;;  %v208_v32 = vpop.permute.xlu1 %207 }
  0xa0   : > { %v203_v30 = vadd.f32 %v202_v29, %v199_v28 }
  0xa3   : > { %v205_v31 = vpop.permute.xlu0 %204 }
  0xa4   : > { %v206_v33 = vadd.f32 %v205_v31, %v203_v30 }
  0xa6   : > { %v209_v34 = vadd.f32 %v208_v32, %v206_v33 }
  0xa8   : > { %346 = vrsqrt.f32 %v209_v34  ;;  %vm212_vm0 = vcmp.eq.f32.partialorder %v209_v34, inf  ;;  %v215_v37 = vand.u32 2147483648, %v209_v34  ;;  %vm214_vm2 = vcmp.eq.f32.partialorder %v209_v34, 0.0 }
  0xb2   : > { %v347_v35 = vpop.eup %346 }
  0xb3   : > { %v211_v36 = vmul.f32 %v347_v35, %v209_v34 }
  0xb5   : > { %v213_v38 = vsel %vm212_vm0, %v209_v34, %v211_v36 }
  0xb6   : > { %v216_v39 = vsel %vm214_vm2, %v215_v37, %v213_v38 }
  0xb7   : > { %v218_v40 = vsel %vm217_vm1, %v216_v39, 0.0 }
  0xb8   : > { %219 = vadd.xlane.f32.xlu1 %v218_v40 }
 0x145   : > { %v220_v41 = vpop.xlane.xlu1 %219 }
 0x146   : > { %v222_v42 = vmul.f32 0.0078125, %v220_v41 }
 0x148   : > { %v223_v43 = vadd.f32 1e-06, %v222_v42 }
 0x14a   : > { %348 = vrcp.f32 %v223_v43 }
 0x154   : > { %v349_v46 = vpop.eup %348 }
 0x155   : > { %v225_v48 = vmul.f32 %v349_v46, %v216_v39 }
 0x157   : > { %v227_v50 = vmul.f32 %v226_v47, %v225_v48 }
 0x159   : > { %v228_v51 = vadd.f32 1.0, %v227_v50 }
 0x15b   : > { %v234_v52 = vrot.slane %v228_v51, %v233_v49 }
 0x15d   : > { %v236_v54 = vmul.f32 %v234_v52, %v397_v0  ;;  %v237_v55 = vmul.f32 %v234_v52, %v399_v1  ;;  %v238_v56 = vmul.f32 %v234_v52, %v401_v2  ;;  %v239_v57 = vmul.f32 %v234_v52, %v403_v3 }
 0x15e   : > { %v240_v58 = vmul.f32 %v234_v52, %v411_v7  ;;  %v241_v59 = vmul.f32 %v234_v52, %v176_v10  ;;  %v242_v60 = vmul.f32 %v234_v52, %v177_v13  ;;  %v243_v61 = vmul.f32 %v234_v52, %v178_v16 }
 0x15f   : > { %v250_v62 = vadd.f32 %v330_v53, %v236_v54  ;;  %v251_v63 = vadd.f32 %v330_v53, %v237_v55  ;;  %v252_v4 = vadd.f32 %v330_v53, %v238_v56  ;;  %v253_v0 = vadd.f32 %v330_v53, %v239_v57 }
 0x160   : > { %v254_v5 = vadd.f32 %v330_v53, %v240_v58  ;;  %v255_v1 = vadd.f32 %v330_v53, %v241_v59  ;;  %v256_v6 = vadd.f32 %v330_v53, %v242_v60  ;;  %v257_v2 = vadd.f32 %v330_v53, %v243_v61 }
 0x161   : > { %258 = vst [vmem:[%s170_s27] sm:$0xff] %v250_v62  ;;  %259 = vst [vmem:[%s170_s27 + $0x8] sm:$0xff] %v251_v63 }
 0x162   : > { %260 = vst [vmem:[%s170_s27 + $0x10] sm:$0xff] %v252_v4  ;;  %261 = vst [vmem:[%s170_s27 + $0x18] sm:$0xff] %v253_v0 }
 0x163   : > { %262 = vst [vmem:[%s170_s27 + $0x20] sm:$0xff] %v254_v5  ;;  %263 = vst [vmem:[%s170_s27 + $0x28] sm:$0xff] %v255_v1 }
 0x164   : > { %264 = vst [vmem:[%s170_s27 + $0x30] sm:$0xff] %v256_v6  ;;  %265 = vst [vmem:[%s170_s27 + $0x38] sm:$0xff] %v257_v2 }
 0x165 PF: > { %s13_s12 = sadd.s32 1, %s356_s12  }
 0x166   : > { %p10_p4 = scmp.ge.s32.totalorder %s13_s12, 4  }
 0x168   :  { %12 = sbr.rel (!%p10_p4) target bundleno = 1 (0x1), region = 62 }

</bundles_post_ra>
